<compile_context>
chip_gen: v7x
topology: tpu7x:2x2x1
jax: 0.10.0
libtpu: 0.0.40
codegen_flags: <defaults>
</compile_context>

<pallas_src>
import functools

import jax
import jax.numpy as jnp
from jax import lax
from jax.experimental import pallas as pl
from jax.experimental.pallas import tpu as pltpu

_LANES = 128
_ACC_ROWS = 256                         # (256, 128) f32 accumulator = 128 KiB VMEM
_TARGET_BLOCK_BYTES = 4 * 1024 * 1024   # ~4 MiB per input block
_SMALL_FALLBACK_ELEMS = 1024            # below this, kernel launch overhead dominates


def _round_up(v, m):
    return ((v + m - 1) // m) * m


def _num_parallel_tensorcores():
    """TensorCores the leading 'parallel' grid axis can shard across.

    Only v7x exposes 2 TensorCores per chip to Pallas; on single-TC chips
    (v5e / v6e) a 2-wide parallel axis is just a redundant sequential epoch,
    so return 1 there.
    """
    try:
        kind = jax.devices()[0].device_kind.lower()
    except Exception:  # defensive: no devices / unusual backend
        return 1
    return 2 if "7" in kind else 1


def _elementwise(x, mode, target_val, sign):
    """Per-element transform f(x) whose mean is the GAN loss.

    mode:
      "vanilla"    -> BCE-with-logits vs constant target `target_val`
      "lsgan"      -> (x - target_val)^2
      "hinge_disc" -> relu(1 + sign * x)
      "mean"       -> x               (wgan and hinge-generator)
    """
    x = x.astype(jnp.float32)
    if mode == "vanilla":
        # Numerically stable BCE-with-logits against a constant target:
        #   max(x, 0) - x*t + log(1 + exp(-|x|))
        # NOTE (perf): with bf16 inputs this mode becomes EUP-bound on v6e/v7x
        # (2 transcendentals/element vs one EUP slot); we keep the f32 path for
        # accuracy and because f32 inputs remain HBM-bound on all generations.
        t = jnp.float32(target_val)
        return jnp.maximum(x, 0.0) - x * t + jnp.log1p(jnp.exp(-jnp.abs(x)))
    if mode == "lsgan":
        d = x - jnp.float32(target_val)
        return d * d
    if mode == "hinge_disc":
        return jnp.maximum(1.0 + jnp.float32(sign) * x, 0.0)
    if mode == "mean":
        return x
    raise NotImplementedError(mode)


def _gan_sum_kernel(x_ref, out_ref, acc_ref, *, mode, target_val, sign,
                    n_blocks, tile_rows, acc_rows, valid_rows):
    """Per-core partial sum of f(x) over this core's slice of row-blocks."""
    c = pl.program_id(0)                 # parallel (TensorCore) axis
    s = pl.program_id(1)                 # sequential reduction axis
    steps = pl.num_programs(1)
    # Global block index MUST come from the unclamped (c, s): padded grid steps
    # on the last core get gb >= n_blocks and skip both accumulate branches
    # (their index_map re-reads the final block, but it is never added again).
    gb = c * steps + s

    n_chunks = tile_rows // acc_rows     # static; tile_rows % acc_rows == 0

    @pl.when(s == 0)
    def _():
        acc_ref[...] = jnp.zeros_like(acc_ref)

    def chunk_f(k):
        start = pl.multiple_of(k * acc_rows, acc_rows)
        return _elementwise(x_ref[pl.ds(start, acc_rows), :],
                            mode, target_val, sign)

    if n_blocks > 1:
        # Interior blocks: pure elementwise accumulate — no mask, no reduction.
        @pl.when(gb < n_blocks - 1)
        def _():
            def body(k, carry):
                acc_ref[...] += chunk_f(k)
                return carry
            lax.fori_loop(0, n_chunks, body, 0)

    # Only the single tail block pays for the row-validity mask.  Rows beyond
    # `valid_rows` come from an edge block and are uninitialized; the select
    # keeps any NaN/Inf they produce (e.g. exp of garbage) out of the sum.
    @pl.when(gb == n_blocks - 1)
    def _():
        base = gb * tile_rows
        def body(k, carry):
            fk = chunk_f(k)
            row = base + k * acc_rows + lax.broadcasted_iota(jnp.int32, fk.shape, 0)
            acc_ref[...] += jnp.where(row < valid_rows, fk, 0.0)
            return carry
        lax.fori_loop(0, n_chunks, body, 0)

    # One cross-lane (XLU) reduction + SMEM scalar store per core, at the end.
    @pl.when(s == steps - 1)
    def _():
        out_ref[0, 0] = jnp.sum(acc_ref[...])


def _reduce_mean(x, *, mode, target_val=0.0, sign=1.0,
                 block_bytes=_TARGET_BLOCK_BYTES):
    """mean_i f(x_i) over all elements of x, as an f32 scalar."""
    n = int(x.size)
    flat = x.reshape(-1)

    # Tiny inputs: a fused XLA elementwise+reduce beats kernel launch overhead.
    if n < _SMALL_FALLBACK_ELEMS:
        return jnp.sum(_elementwise(flat, mode, target_val, sign)) / jnp.float32(n)

    rows = n // _LANES                   # full 128-lane rows
    tail_elems = n - rows * _LANES       # ragged tail (< 128 elements)

    tail_sum = jnp.float32(0.0)
    if tail_elems:
        # Fold the <128-element ragged tail in with plain JAX instead of
        # jnp.pad-ing the whole tensor (which re-materializes it in HBM).
        tail_sum = jnp.sum(_elementwise(lax.slice(flat, (rows * _LANES,), (n,)),
                                        mode, target_val, sign))
        flat = lax.slice(flat, (0,), (rows * _LANES,))
    x2 = flat.reshape(rows, _LANES)      # free reshape for 128-aligned inputs

    # Block sizing: ~block_bytes per block (amortizes per-grid-step overhead),
    # accumulator size decoupled from the block size.
    itemsize = x2.dtype.itemsize
    if rows <= _ACC_ROWS:
        acc_rows = tile_rows = _round_up(rows, 8)
    else:
        acc_rows = _ACC_ROWS
        budget_rows = max(_ACC_ROWS,
                          (block_bytes // (_LANES * itemsize)) // _ACC_ROWS * _ACC_ROWS)
        tile_rows = min(budget_rows, _round_up(rows, _ACC_ROWS))

    n_blocks = pl.cdiv(rows, tile_rows)
    n_par = min(_num_parallel_tensorcores(), n_blocks)
    steps = pl.cdiv(n_blocks, n_par)

    def x_index_map(c, s):
        # Clamp so padded grid steps on the last core just re-read the final
        # block; their contribution is skipped inside the kernel (gb check).
        return (jnp.minimum(c * steps + s, n_blocks - 1), 0)

    kernel = functools.partial(
        _gan_sum_kernel,
        mode=mode, target_val=float(target_val), sign=float(sign),
        n_blocks=n_blocks, tile_rows=tile_rows, acc_rows=acc_rows,
        valid_rows=rows)

    partial_sums = pl.pallas_call(
        kernel,
        out_shape=jax.ShapeDtypeStruct((n_par, 1), jnp.float32),
        grid_spec=pltpu.PrefetchScalarGridSpec(
            num_scalar_prefetch=0,
            grid=(n_par, steps),
            in_specs=[pl.BlockSpec((tile_rows, _LANES), x_index_map)],
            out_specs=pl.BlockSpec(
                (1, 1), lambda c, s: (c, 0),
                memory_space=pltpu.MemorySpace.SMEM),
            scratch_shapes=[pltpu.VMEM((acc_rows, _LANES), jnp.float32)]),
        compiler_params=pltpu.CompilerParams(
            dimension_semantics=("parallel", "arbitrary")),
    )(x2)

    return (jnp.sum(partial_sums) + tail_sum) / jnp.float32(n)


class GANLossPallas:
    """Pallas re-implementation of mmsr GANLoss.forward.

    Supports gan_type in {'vanilla', 'lsgan', 'wgan', 'hinge'}.
    `target_is_real` and `is_disc` are static Python bools (as in PyTorch usage).
    """

    def __init__(self, gan_type, real_label_val=1.0, fake_label_val=0.0,
                 loss_weight=1.0):
        if gan_type not in ("vanilla", "lsgan", "wgan", "hinge"):
            raise NotImplementedError(f"GAN type {gan_type} is not implemented.")
        self.gan_type = gan_type
        self.real_label_val = real_label_val
        self.fake_label_val = fake_label_val
        self.loss_weight = loss_weight

    def __call__(self, x, target_is_real, is_disc=False):
        if self.gan_type == "vanilla":
            t = self.real_label_val if target_is_real else self.fake_label_val
            loss = _reduce_mean(x, mode="vanilla", target_val=t)
        elif self.gan_type == "lsgan":
            t = self.real_label_val if target_is_real else self.fake_label_val
            loss = _reduce_mean(x, mode="lsgan", target_val=t)
        elif self.gan_type == "wgan":
            m = _reduce_mean(x, mode="mean")
            loss = -m if target_is_real else m
        else:  # hinge
            if is_disc:
                sgn = -1.0 if target_is_real else 1.0
                loss = _reduce_mean(x, mode="hinge_disc", sign=sgn)
            else:
                loss = -_reduce_mean(x, mode="mean")
        return loss if is_disc else loss * jnp.float32(self.loss_weight)


# ---------------------------------------------------------------------------
# Pure-JAX reference (for correctness checking only).
# ---------------------------------------------------------------------------
def _ref_gan_loss(gan_type, x, target_is_real, is_disc, real_val=1.0,
                  fake_val=0.0, weight=1.0):
    x = x.astype(jnp.float32)
    if gan_type == "vanilla":
        t = jnp.full_like(x, real_val if target_is_real else fake_val)
        per = jnp.maximum(x, 0.0) - x * t + jnp.log1p(jnp.exp(-jnp.abs(x)))
        loss = per.mean()
    elif gan_type == "lsgan":
        t = jnp.full_like(x, real_val if target_is_real else fake_val)
        loss = ((x - t) ** 2).mean()
    elif gan_type == "wgan":
        loss = -x.mean() if target_is_real else x.mean()
    else:  # hinge
        if is_disc:
            xi = -x if target_is_real else x
            loss = jnp.maximum(1.0 + xi, 0.0).mean()
        else:
            loss = -x.mean()
    return loss if is_disc else loss * weight


if __name__ == "__main__":
    import numpy as np

    key = jax.random.PRNGKey(0)
    k1, k2, k3, k4 = jax.random.split(key, 4)

    # Primary spec-consistent input: NCHW (2, 4, 16, 16), 128-aligned -> kernel path.
    x = jax.random.normal(k1, (2, 4, 16, 16), dtype=jnp.float32)

    n_cases = 0
    for gan_type in ("vanilla", "lsgan", "wgan", "hinge"):
        mod = GANLossPallas(gan_type, loss_weight=0.5)
        for target_is_real in (True, False):
            for is_disc in (True, False):
                out = jax.block_until_ready(mod(x, target_is_real, is_disc))
                ref = _ref_gan_loss(gan_type, x, target_is_real, is_disc, weight=0.5)
                np.testing.assert_allclose(np.asarray(out), np.asarray(ref),
                                           rtol=1e-5, atol=1e-5)
                n_cases += 1
    assert n_cases == 16

    # Chunked-accumulator + masked-tail-block path (rows > _ACC_ROWS).
    x_b = jax.random.normal(k2, (2, 8, 48, 48), dtype=jnp.float32)   # 36864 elems
    out = jax.block_until_ready(GANLossPallas("lsgan")(x_b, True, True))
    np.testing.assert_allclose(
        np.asarray(out), np.asarray(_ref_gan_loss("lsgan", x_b, True, True)),
        rtol=1e-5, atol=1e-5)

    # Ragged (non-128-multiple) size: tail folded in plain JAX, no whole-array pad.
    x_r = jax.random.normal(k3, (1, 5, 86, 86), dtype=jnp.float32)   # 36980 elems
    out = jax.block_until_ready(GANLossPallas("vanilla")(x_r, False, False))
    np.testing.assert_allclose(
        np.asarray(out), np.asarray(_ref_gan_loss("vanilla", x_r, False, False)),
        rtol=1e-5, atol=1e-5)

    # Multi-block grid (and 2-TensorCore sharding on v7x): force small blocks.
    got = jax.block_until_ready(
        _reduce_mean(x_b, mode="hinge_disc", sign=1.0, block_bytes=128 * 1024))
    exp = jnp.maximum(1.0 + x_b.astype(jnp.float32), 0.0).mean()
    np.testing.assert_allclose(np.asarray(got), np.asarray(exp),
                               rtol=1e-5, atol=1e-5)

    # Tiny-input plain-JAX fallback path.
    x_s = jax.random.normal(k4, (1, 2, 10, 10), dtype=jnp.float32)   # 200 elems
    out = jax.block_until_ready(GANLossPallas("wgan", loss_weight=0.5)(x_s, True, False))
    np.testing.assert_allclose(
        np.asarray(out),
        np.asarray(_ref_gan_loss("wgan", x_s, True, False, weight=0.5)),
        rtol=1e-5, atol=1e-5)

    print("KERNEL_OK")
</pallas_src>

<mosaic_0001>
module attributes {stable_mosaic.version = 11 : i64} {
  func.func @_gan_sum_kernel(%arg0: i32, %arg1: i32, %arg2: memref<16x128xf32, #tpu.memory_space<vmem>>, %arg3: memref<1x1xf32, #tpu.memory_space<smem>>, %arg4: memref<16x128xf32, #tpu.memory_space<vmem>>) attributes {dimension_semantics = [#tpu.dimension_semantics<parallel>, #tpu.dimension_semantics<arbitrary>], iteration_bounds = array<i64: 1, 1>, scalar_prefetch = 0 : i64, scratch_operands = 1 : i64, tpu.core_type = #tpu.core_type<tc>, window_params = [{transform_indices = @transform_0, window_bounds = array<i64: 16, 128>}, {transform_indices = @transform_1, window_bounds = array<i64: 1, 1>}]} {
    %c1_i32 = arith.constant 1 : i32
    %0 = arith.muli %arg0, %c1_i32 : i32
    %1 = arith.addi %0, %arg1 : i32
    %c0_i32 = arith.constant 0 : i32
    %2 = arith.cmpi eq, %arg1, %c0_i32 : i32
    %3 = arith.extui %2 : i1 to i32
    %c0_i32_0 = arith.constant 0 : i32
    %4 = arith.cmpi ne, %3, %c0_i32_0 : i32
    scf.if %4 {
      %cst = arith.constant 0.000000e+00 : f32
      %11 = vector.broadcast %cst : f32 to vector<16x128xf32>
      %c0 = arith.constant 0 : index
      %c0_5 = arith.constant 0 : index
      %12 = vector.load %arg4[%c0, %c0_5] : memref<16x128xf32, #tpu.memory_space<vmem>>, vector<16x128xf32>
      tpu.vector_store %arg4[%c0, %c0_5], %11 {strides = array<i32>} : memref<16x128xf32, #tpu.memory_space<vmem>>, vector<16x128xf32>,
    } else {
    }
    %c0_i32_1 = arith.constant 0 : i32
    %5 = arith.cmpi eq, %1, %c0_i32_1 : i32
    %6 = arith.extui %5 : i1 to i32
    %c0_i32_2 = arith.constant 0 : i32
    %7 = arith.cmpi ne, %6, %c0_i32_2 : i32
    scf.if %7 {
      %c16_i32 = arith.constant 16 : i32
      %11 = arith.muli %1, %c16_i32 : i32
      %c0_i32_5 = arith.constant 0 : i32
      %c16_i32_6 = arith.constant 16 : i32
      %12 = arith.muli %c0_i32_5, %c16_i32_6 : i32
      %13 = tpu.assume_multiple %12, 16 : i32
      %14 = arith.index_cast %13 : i32 to index
      %c0 = arith.constant 0 : index
      %15 = vector.load %arg2[%14, %c0] : memref<16x128xf32, #tpu.memory_space<vmem>>, vector<16x128xf32>
      %cst = arith.constant 0.000000e+00 : f32
      %16 = vector.broadcast %cst : f32 to vector<16x128xf32>
      %17 = arith.maximumf %15, %16 : vector<16x128xf32>
      %cst_7 = arith.constant 1.000000e+00 : f32
      %18 = vector.broadcast %cst_7 : f32 to vector<16x128xf32>
      %19 = arith.mulf %15, %18 : vector<16x128xf32>
      %20 = arith.subf %17, %19 : vector<16x128xf32>
      %21 = math.absf %15 : vector<16x128xf32>
      %cst_8 = arith.constant 0.000000e+00 : f32
      %22 = vector.broadcast %cst_8 : f32 to vector<16x128xf32>
      %23 = arith.subf %22, %21 : vector<16x128xf32>
      %24 = math.exp %23 : vector<16x128xf32>
      %25 = math.log1p %24 : vector<16x128xf32>
      %26 = arith.addf %20, %25 : vector<16x128xf32>
      %c16_i32_9 = arith.constant 16 : i32
      %27 = arith.muli %c0_i32_5, %c16_i32_9 : i32
      %28 = arith.addi %11, %27 : i32
      %29 = tpu.iota {dimensions = array<i32: 0>} : vector<16x128xi32>
      %30 = vector.broadcast %28 : i32 to vector<16x128xi32>
      %31 = arith.addi %30, %29 : vector<16x128xi32>
      %c0_10 = arith.constant 0 : index
      %c0_11 = arith.constant 0 : index
      %32 = vector.load %arg4[%c0_10, %c0_11] : memref<16x128xf32, #tpu.memory_space<vmem>>, vector<16x128xf32>
      %c16_i32_12 = arith.constant 16 : i32
      %33 = vector.broadcast %c16_i32_12 : i32 to vector<16x128xi32>
      %34 = arith.cmpi slt, %31, %33 : vector<16x128xi32>
      %cst_13 = arith.constant 0.000000e+00 : f32
      %35 = vector.broadcast %cst_13 : f32 to vector<16x128xf32>
      %36 = arith.select %34, %26, %35 : vector<16x128xi1>, vector<16x128xf32>
      %37 = arith.addf %32, %36 : vector<16x128xf32>
      %c0_14 = arith.constant 0 : index
      %c0_15 = arith.constant 0 : index
      %38 = vector.load %arg4[%c0_14, %c0_15] : memref<16x128xf32, #tpu.memory_space<vmem>>, vector<16x128xf32>
      tpu.vector_store %arg4[%c0_14, %c0_15], %37 {strides = array<i32>} : memref<16x128xf32, #tpu.memory_space<vmem>>, vector<16x128xf32>,
      %c1_i32_16 = arith.constant 1 : i32
    } else {
    }
    %c0_i32_3 = arith.constant 0 : i32
    %8 = arith.cmpi eq, %arg1, %c0_i32_3 : i32
    %9 = arith.extui %8 : i1 to i32
    %c0_i32_4 = arith.constant 0 : i32
    %10 = arith.cmpi ne, %9, %c0_i32_4 : i32
    scf.if %10 {
      %c0 = arith.constant 0 : index
      %c0_5 = arith.constant 0 : index
      %11 = vector.load %arg4[%c0, %c0_5] : memref<16x128xf32, #tpu.memory_space<vmem>>, vector<16x128xf32>
      %12 = vector.shape_cast %11 : vector<16x128xf32> to vector<1x16x128xf32>
      %cst = arith.constant dense<0.000000e+00> : vector<1xf32>
      %13 = vector.multi_reduction <add>, %12, %cst [1, 2] : vector<1x16x128xf32> to vector<1xf32>
      %14 = vector.shape_cast %13 : vector<1xf32> to vector<1x1x1xf32>
      %15 = vector.extract %14[0, 0, 0] : f32 from vector<1x1x1xf32>
      %c0_6 = arith.constant 0 : index
      %c0_7 = arith.constant 0 : index
      %16 = memref.load %arg3[%c0_6, %c0_7] : memref<1x1xf32, #tpu.memory_space<smem>>
      memref.store %15, %arg3[%c0_6, %c0_7] : memref<1x1xf32, #tpu.memory_space<smem>>
    } else {
    }
    return
  }
  func.func @transform_0(%arg0: i32, %arg1: i32) -> (i32, i32) {
    %c1_i32 = arith.constant 1 : i32
    %0 = arith.muli %arg0, %c1_i32 : i32
    %1 = arith.addi %0, %arg1 : i32
    %c0_i32 = arith.constant 0 : i32
    %2 = arith.minsi %1, %c0_i32 : i32
    %c0_i32_0 = arith.constant 0 : i32
    %c0_i32_1 = arith.constant 0 : i32
    return %2, %c0_i32_0 : i32, i32
  }
  func.func @transform_1(%arg0: i32, %arg1: i32) -> (i32, i32) {
    %c0_i32 = arith.constant 0 : i32
    %c0_i32_0 = arith.constant 0 : i32
    return %arg0, %c0_i32 : i32, i32
  }
}

</mosaic_0001>

<bundles_post_ra>
// kernel: tpu_custom_call.1
= control target key start
LH: loop header
LB: loop body
LE: loop exit
PB: predicated region body
PF: predicated region fallthrough
CT: control target
= control target key end

     0   :  { %6 = vsyncpa [#allocation4], 0  ;;  %s216_s0 = inlined_call_operand.hbm [shape: f32[16,128], index: 0, kind: input, shape index: {}]   ;;  %s217_s1 = inlined_call_operand.hbm [shape: f32[1,1], index: 1, kind: output, shape index: {}]  }
   0x1   :  { %7 = vsyncpa [#allocation5], 0  ;;  %s178_s6 = smov [#allocation3]   ;;  %s142_s10 = scalar_lea.hbm %s216_s0, 256 }
   0x2   :  { %s19_s7 = sshll.u32 %s178_s6, 4  ;;  %p143_p0 = scmp.ne.s32.totalorder %s216_s0, %s142_s10  ;;  %s20_s7 = int_to_ptr.vmem [resolvable:$true] %s19_s7 }
   0x3   :  { %p146_p1 = scmp.lt.u32.totalorder %s142_s10, %s216_s0 }
   0x5   :  { %p148_p2 = pnand %p146_p1, %p143_p0 }
   0x7   :  { %151 = shalt.err (!%p148_p2)
}
   0x8   :  { %s152_s15 = scalar_lea.vmem %s20_s7, 256  ;;  %p157_p4 = scmp.lt.s32.totalorder %s20_s7, %s20_s7 }
   0x9   :  { %p153_p3 = scmp.ne.s32.totalorder %s20_s7, %s152_s15  ;;  %p158_p5 = scmp.lt.s32.totalorder %s152_s15, %s152_s15 }
   0xb   :  { %p159_p6 = por %p158_p5, %p157_p4 }
   0xd   :  { %p160_p7 = pnand %p159_p6, %p153_p3 }
   0xf   :  { %163 = shalt.err (!%p160_p7)
}
  0x10   :  { %s179_s16 = smov 128   ;;  %s180_s17 = smov 8  }
  0x11   :  { %25 = dma.hbm_to_vmem [thread:$0]  %s216_s0, 256, %s20_s7, [#allocation4], %s179_s16, %s179_s16, %s180_s17  }
  0x12   :  { %174 = dma.done.wait [#allocation4], 256  }
  0x13   :  { %175 = vsyncadd [#allocation4], 4294967040  ;;  %v45_v0 = vld [vmem:[#allocation3] sm:$0xff]  ;;  %v46_v1 = vld [vmem:[#allocation3 + $0x8] sm:$0xff]  ;;  %s164_s22 = scalar_lea.hbm %s217_s1, 16 }
  0x14   :  { %v51_v2 = vand.u32 2147483647, %v45_v0  ;;  %v52_v3 = vand.u32 2147483647, %v46_v1  ;;  %v47_v15 = vmax.f32 %v45_v0, 0.0  ;;  %v48_v18 = vmax.f32 %v46_v1, 0.0  ;;  %p165_p8 = scmp.ne.s32.totalorder %s217_s1, %s164_s22  ;;  %p168_p9 = scmp.lt.u32.totalorder %s164_s22, %s217_s1 }
  0x16   :  { %v53_v4 = vsub.f32 0.0, %v51_v2  ;;  %v54_v5 = vsub.f32 0.0, %v52_v3  ;;  %v49_v22 = vsub.f32 %v47_v15, %v45_v0  ;;  %v50_v25 = vsub.f32 %v48_v18, %v46_v1  ;;  %p170_p10 = pnand %p168_p9, %p165_p8 }
  0x18   :  { %v55_v6 = vmul.f32 1.442695, %v53_v4  ;;  %v57_v7 = vmul.f32 1.442695, %v54_v5 }
  0x1a   :  { %134 = vpow2.f32 %v55_v6 }
  0x1b   :  { %136 = vpow2.f32 %v57_v7 }
  0x24   :  { %v135_v8 = vpop.eup %134 }
  0x25   :  { %v137_v9 = vpop.eup %136  ;;  %v59_v10 = vadd.f32 1.0, %v135_v8  ;;  %v62_v12 = vmul.f32 -0.5, %v135_v8  ;;  %v65_v16 = vand.u32 2147483647, %v135_v8 }
  0x26   :  { %v68_v11 = vadd.f32 1.0, %v137_v9  ;;  %v71_v13 = vmul.f32 -0.5, %v137_v9  ;;  %v74_v19 = vand.u32 2147483647, %v137_v9 }
  0x27   :  { %138 = vlog2.f32 %v59_v10  ;;  %v63_v14 = vadd.f32 1.0, %v62_v12  ;;  %vm66_vm0 = vcmp.lt.f32.partialorder %v65_v16, 0.0004427343 }
  0x28   :  { %140 = vlog2.f32 %v68_v11  ;;  %v72_v17 = vadd.f32 1.0, %v71_v13  ;;  %vm75_vm1 = vcmp.lt.f32.partialorder %v74_v19, 0.0004427343 }
  0x29   :  { %v64_v20 = vmul.f32 %v135_v8, %v63_v14 }
  0x2a   :  { %v73_v23 = vmul.f32 %v137_v9, %v72_v17 }
  0x31   :  { %v139_v21 = vpop.eup %138 }
  0x32   :  { %v141_v24 = vpop.eup %140  ;;  %v61_v26 = vmul.f32 0.6931472, %v139_v21 }
  0x33   :  { %v70_v27 = vmul.f32 0.6931472, %v141_v24 }
  0x34   :  { %v67_v28 = vsel %vm66_vm0, %v64_v20, %v61_v26 }
  0x35   :  { %v76_v29 = vsel %vm75_vm1, %v73_v23, %v70_v27  ;;  %v77_v30 = vadd.f32 %v67_v28, %v49_v22 }
  0x36   :  { %v78_v31 = vadd.f32 %v76_v29, %v50_v25 }
  0x38   :  { %v100_v32 = vadd.f32 %v78_v31, %v77_v30 }
  0x3a   :  { %101 = vadd.xlane.f32.xlu0 %v100_v32 }
  0xc7   :  { %v102_v33 = vpop.xlane.xlu0 %101 }
  0xc8   :  { %v103_v34 = vrot.slane %v102_v33, 4 }
  0xca   :  { %v104_v35 = vadd.f32 %v103_v34, %v102_v33 }
  0xcc   :  { %v105_v36 = vrot.slane %v104_v35, 2 }
  0xce   :  { %v106_v37 = vadd.f32 %v105_v36, %v104_v35 }
  0xd0   :  { %v107_v38 = vrot.slane %v106_v37, 1 }
  0xd2   :  { %v108_v39 = vadd.f32 %v107_v38, %v106_v37 }
  0xd4   :  { %128 = vpush %v108_v39 }
 0x105   :  { %s129_s0 = spop %128 }
 0x106   :  { %111 = sst [smem:[#allocation6]] %s129_s0 }
 0x107   :  { %173 = shalt.err (!%p170_p10)
}
 0x108   :  { %s181_s27 = smov [#allocation6]  }
 0x109   :  { %119 = dma.smem_to_hbm %s181_s27, 16, %s217_s1, [#allocation5]  }
 0x10a   :  { %176 = dma.done.wait [#allocation5], 16  }
 0x10b   :  { %177 = vsyncadd [#allocation5], 4294967280 }
 0x10c   :  { %123 = sfence }
 0x10d   :  { %124 = vsyncpa [#allocation4], 1 }
 0x10e   :  { %125 = vsyncpa [#allocation5], 1 }

</bundles_post_ra>
